<compile_context>
chip_gen: v7x
topology: tpu7x:2x2x1
jax: 0.10.0
libtpu: 0.0.40
codegen_flags: <defaults>
</compile_context>

<pallas_src>
import jax
import jax.numpy as jnp
from jax.experimental import pallas as pl
from jax.experimental.pallas import tpu as pltpu

CONV_K = 11            # attention_conv kernel size (hard-coded in the module)
CONV_PAD = 5
CONV_CH = 512          # attention_conv output channels (hard-coded)
KK = CONV_K * CONV_K   # 121
KP = 128               # 121 zero-padded to the MXU-friendly 128


def _energy_kernel(patches_ref, trans_ref, h_ref, wq_ref, bq_ref, wcov_ref,
                   we_ref, be_ref, energy_ref):
    """Per-batch: query + folded coverage conv + tanh + alpha_convert."""
    # query = hidden_weight(hidden): single-row Linear -> VPU mul + lane reduce.
    q = jnp.sum(wq_ref[...] * h_ref[0], axis=1, keepdims=True) + bq_ref[...]
    # coverage = attention_weight(attention_conv(alpha_sum)) with the Linear
    # folded into the conv weights: one bf16 MXU matmul (A, 128) @ (128, HW).
    cov = jnp.dot(wcov_ref[...], patches_ref[0],
                  preferred_element_type=jnp.float32)            # (A, HW) f32
    score = jnp.tanh(q + cov + trans_ref[0])                     # (A, HW) f32
    # alpha_convert (Linear A -> 1): sublane reduction -> lane-dense (1, HW).
    energy = jnp.sum(we_ref[...] * score, axis=0, keepdims=True) + be_ref[0]
    energy_ref[0] = energy


def _softmax_context_kernel(emax_ref, energy_ref, mask_ref, asum_ref, cnn_ref,
                            alpha_ref, asum_out_ref, ctx_ref):
    """Per-batch: exp / mask / normalize, alpha_sum update, context (MXU)."""
    e_max = emax_ref[0]                                 # global max (SMEM scalar)
    e_exp = jnp.exp(energy_ref[0] - e_max) * mask_ref[0]         # (1, HW)
    denom = jnp.sum(e_exp, axis=-1, keepdims=True) + 1e-10       # (1, 1)
    alpha = e_exp * pl.reciprocal(denom, approx=True)            # (1, HW)
    alpha_ref[0] = alpha
    asum_out_ref[0] = alpha + asum_ref[0]
    # context[c] = sum_hw alpha[hw] * cnn[c, hw] on the MXU, lane-dense (1, C).
    ctx_ref[0] = jax.lax.dot_general(
        alpha.astype(jnp.bfloat16), cnn_ref[0],
        dimension_numbers=(((1,), (1,)), ((), ())),
        preferred_element_type=jnp.float32)                      # (1, C)


def _im2col_1ch_transposed(x, k, pad):
    """(B, 1, H, W) -> (B, k*k, H*W): conv taps on sublanes, HW on lanes."""
    B, _, H, W = x.shape
    xp = jnp.pad(x[:, 0], ((0, 0), (pad, pad), (pad, pad)))
    cols = [xp[:, kh:kh + H, kw:kw + W].reshape(B, H * W)
            for kh in range(k) for kw in range(k)]
    return jnp.stack(cols, axis=1)


@jax.jit
def attention_forward(cnn_features, cnn_features_trans, hidden, alpha_sum,
                      image_mask, params):
    B, C, H, W = cnn_features.shape
    HW = H * W
    A, HIDDEN = params["hidden_w"].shape
    f32, bf16 = jnp.float32, jnp.bfloat16
    hp = jax.lax.Precision.HIGHEST

    # ---- weight prep (constant-folded under jit) -------------------------
    wcov = jnp.dot(params["attn_w"], params["conv_w"].reshape(CONV_CH, KK),
                   precision=hp)                                  # (A, 121)
    wcov = jnp.pad(wcov, ((0, 0), (0, KP - KK))).astype(bf16)     # (A, KP)
    wq = params["hidden_w"].astype(f32)                           # (A, HIDDEN)
    bq = params["hidden_b"].reshape(A, 1).astype(f32)             # (A, 1)
    we = params["convert_w"].reshape(A, 1).astype(f32)            # (A, 1)
    be = params["convert_b"].reshape(1).astype(f32)               # SMEM scalar

    # ---- input prep (layout only; HW stays on the lane axis) -------------
    patches = jnp.pad(_im2col_1ch_transposed(alpha_sum, CONV_K, CONV_PAD),
                      ((0, 0), (0, KP - KK), (0, 0))).astype(bf16)  # (B,KP,HW)
    trans = cnn_features_trans.reshape(B, A, HW).astype(bf16)       # (B,A,HW)
    h_row = hidden.reshape(B, 1, HIDDEN).astype(f32)                 # (B,1,hid)

    full2 = lambda b: (0, 0)
    perb3 = lambda b: (b, 0, 0)
    smem_spec = pl.BlockSpec(memory_space=pltpu.MemorySpace.SMEM)

    # -------- pass 1: per-batch energies (lane-dense (B, 1, HW)) ----------
    energy = pl.pallas_call(
        _energy_kernel,
        out_shape=jax.ShapeDtypeStruct((B, 1, HW), f32),
        grid_spec=pltpu.PrefetchScalarGridSpec(
            num_scalar_prefetch=0,
            grid=(B,),
            in_specs=[
                pl.BlockSpec((1, KP, HW), perb3),        # conv patches (bf16)
                pl.BlockSpec((1, A, HW), perb3),         # cnn_features_trans (bf16)
                pl.BlockSpec((1, 1, HIDDEN), perb3),     # hidden state
                pl.BlockSpec((A, HIDDEN), full2),        # hidden_weight
                pl.BlockSpec((A, 1), full2),             # hidden_weight bias
                pl.BlockSpec((A, KP), full2),            # folded conv weight
                pl.BlockSpec((A, 1), full2),             # alpha_convert weight
                smem_spec,                               # alpha_convert bias
            ],
            out_specs=pl.BlockSpec((1, 1, HW), perb3),
        ),
        compiler_params=pltpu.CompilerParams(
            dimension_semantics=("parallel",)),
    )(patches, trans, h_row, wq, bq, wcov, we, be)

    # Global max over ALL batches (module semantics), computed once here.
    e_max = jnp.max(energy).reshape(1).astype(f32)

    # -------- pass 2: softmax + alpha_sum + context ------------------------
    if image_mask is None:
        mask = jnp.ones((B, 1, HW), f32)
    else:
        mask = image_mask.reshape(B, 1, HW).astype(f32)
    asum = alpha_sum.reshape(B, 1, HW).astype(f32)
    cnn = cnn_features.reshape(B, C, HW).astype(bf16)

    alpha, asum_new, ctx = pl.pallas_call(
        _softmax_context_kernel,
        out_shape=(
            jax.ShapeDtypeStruct((B, 1, HW), f32),
            jax.ShapeDtypeStruct((B, 1, HW), f32),
            jax.ShapeDtypeStruct((B, 1, C), f32),
        ),
        grid_spec=pltpu.PrefetchScalarGridSpec(
            num_scalar_prefetch=0,
            grid=(B,),
            in_specs=[
                smem_spec,                                      # global e_max
                pl.BlockSpec((1, 1, HW), perb3),                # energy (per batch)
                pl.BlockSpec((1, 1, HW), perb3),                # image mask
                pl.BlockSpec((1, 1, HW), perb3),                # alpha_sum (old)
                pl.BlockSpec((1, C, HW), perb3),                # cnn_features (bf16)
            ],
            out_specs=[
                pl.BlockSpec((1, 1, HW), perb3),                # alpha
                pl.BlockSpec((1, 1, HW), perb3),                # alpha_sum (new)
                pl.BlockSpec((1, 1, C), perb3),                 # context (lane-dense)
            ],
        ),
        compiler_params=pltpu.CompilerParams(
            dimension_semantics=("parallel",)),
    )(e_max, energy, mask, asum, cnn)

    return (ctx.reshape(B, C),
            alpha.reshape(B, H, W),
            asum_new.reshape(B, 1, H, W))


def reference_forward(cnn_features, cnn_features_trans, hidden, alpha_sum,
                      image_mask, params):
    """Pure-JAX f32/HIGHEST reference mirroring the PyTorch module exactly."""
    hp = jax.lax.Precision.HIGHEST
    B, C, H, W = cnn_features.shape
    A = params["hidden_w"].shape[0]
    HW = H * W

    query = jnp.dot(hidden, params["hidden_w"].T, precision=hp) + params["hidden_b"]
    xp = jnp.pad(alpha_sum[:, 0],
                 ((0, 0), (CONV_PAD, CONV_PAD), (CONV_PAD, CONV_PAD)))
    cols = [xp[:, kh:kh + H, kw:kw + W].reshape(B, HW)
            for kh in range(CONV_K) for kw in range(CONV_K)]
    patches = jnp.stack(cols, axis=-1)                      # (B, HW, 121)
    conv_w = params["conv_w"].reshape(CONV_CH, KK)
    ast = jnp.einsum("bpk,ck->bpc", patches, conv_w, precision=hp)
    coverage = jnp.einsum("bpc,ac->bpa", ast, params["attn_w"], precision=hp)
    trans = jnp.transpose(cnn_features_trans.reshape(B, A, HW), (0, 2, 1))
    score = jnp.tanh(query[:, None, :] + coverage + trans)
    energy = (jnp.einsum("bpa,oa->bpo", score, params["convert_w"],
                         precision=hp)[..., 0] + params["convert_b"][0])
    energy = energy - jnp.max(energy)
    e_exp = jnp.exp(energy)
    if image_mask is not None:
        e_exp = e_exp * image_mask.reshape(B, HW)
    alpha = e_exp / (jnp.sum(e_exp, axis=-1, keepdims=True) + 1e-10)
    alpha_sum_new = alpha.reshape(B, 1, H, W) + alpha_sum
    context = jnp.sum(alpha[:, None, :] * cnn_features.reshape(B, C, HW), axis=-1)
    return context, alpha.reshape(B, H, W), alpha_sum_new


if __name__ == "__main__":
    # Small shapes consistent with the module: hidden_size=32, attention_dim=32,
    # H*W = 8*16 = 128 (fully lane-dense); the conv's 512 channels are the
    # module's hard-coded internal width (folded away at runtime).
    B, C, H, W = 2, 32, 8, 16
    HIDDEN, A = 32, 32

    key = jax.random.PRNGKey(0)
    ks = jax.random.split(key, 11)
    params = {
        "hidden_w": 0.05 * jax.random.normal(ks[0], (A, HIDDEN), jnp.float32),
        "hidden_b": 0.05 * jax.random.normal(ks[1], (A,), jnp.float32),
        "conv_w": 0.05 * jax.random.normal(ks[2], (CONV_CH, 1, CONV_K, CONV_K),
                                           jnp.float32),
        "attn_w": 0.05 * jax.random.normal(ks[3], (A, CONV_CH), jnp.float32),
        "convert_w": 0.2 * jax.random.normal(ks[4], (1, A), jnp.float32),
        "convert_b": 0.05 * jax.random.normal(ks[5], (1,), jnp.float32),
    }
    cnn_features = jax.random.normal(ks[6], (B, C, H, W), jnp.float32)
    cnn_features_trans = 0.5 * jax.random.normal(ks[7], (B, A, H, W), jnp.float32)
    hidden = jax.random.normal(ks[8], (B, HIDDEN), jnp.float32)
    alpha_sum = jax.random.uniform(ks[9], (B, 1, H, W), jnp.float32)
    image_mask = (jax.random.uniform(ks[10], (B, 1, H, W)) > 0.2).astype(jnp.float32)

    ctx, alpha, asum_new = attention_forward(
        cnn_features, cnn_features_trans, hidden, alpha_sum, image_mask, params)
    jax.block_until_ready((ctx, alpha, asum_new))

    ctx_r, alpha_r, asum_r = reference_forward(
        cnn_features, cnn_features_trans, hidden, alpha_sum, image_mask, params)

    assert ctx.shape == (B, C)
    assert alpha.shape == (B, H, W)
    assert asum_new.shape == (B, 1, H, W)
    assert float(jnp.max(jnp.abs(ctx - ctx_r))) < 3e-2
    assert float(jnp.max(jnp.abs(alpha - alpha_r))) < 3e-2
    assert float(jnp.max(jnp.abs(asum_new - asum_r))) < 3e-2

    print("KERNEL_OK")
</pallas_src>

<mosaic_0001>
module attributes {stable_mosaic.version = 11 : i64} {
  func.func @_softmax_context_kernel(%arg0: i32, %arg1: memref<1xf32, #tpu.memory_space<smem>>, %arg2: memref<1x1x128xf32, #tpu.memory_space<vmem>>, %arg3: memref<1x1x128xf32, #tpu.memory_space<vmem>>, %arg4: memref<1x1x128xf32, #tpu.memory_space<vmem>>, %arg5: memref<1x32x128xbf16, #tpu.memory_space<vmem>>, %arg6: memref<1x1x128xf32, #tpu.memory_space<vmem>>, %arg7: memref<1x1x128xf32, #tpu.memory_space<vmem>>, %arg8: memref<1x1x32xf32, #tpu.memory_space<vmem>>) attributes {dimension_semantics = [#tpu.dimension_semantics<parallel>], iteration_bounds = array<i64: 2>, scalar_prefetch = 0 : i64, scratch_operands = 0 : i64, tpu.core_type = #tpu.core_type<tc>, window_params = [{transform_indices = @transform_0, window_bounds = array<i64: 1>}, {transform_indices = @transform_1, window_bounds = array<i64: 1, 1, 128>}, {transform_indices = @transform_2, window_bounds = array<i64: 1, 1, 128>}, {transform_indices = @transform_3, window_bounds = array<i64: 1, 1, 128>}, {transform_indices = @transform_4, window_bounds = array<i64: 1, 32, 128>}, {transform_indices = @transform_5, window_bounds = array<i64: 1, 1, 128>}, {transform_indices = @transform_6, window_bounds = array<i64: 1, 1, 128>}, {transform_indices = @transform_7, window_bounds = array<i64: 1, 1, 32>}]} {
    %c0 = arith.constant 0 : index
    %0 = memref.load %arg1[%c0] : memref<1xf32, #tpu.memory_space<smem>>
    %c0_0 = arith.constant 0 : index
    %c0_1 = arith.constant 0 : index
    %c0_2 = arith.constant 0 : index
    %1 = vector.load %arg2[%c0_0, %c0_1, %c0_2] : memref<1x1x128xf32, #tpu.memory_space<vmem>>, vector<1x1x128xf32>
    %2 = vector.shape_cast %1 : vector<1x1x128xf32> to vector<1x128xf32>
    %3 = vector.broadcast %0 : f32 to vector<1x128xf32>
    %4 = arith.subf %2, %3 : vector<1x128xf32>
    %5 = math.exp %4 : vector<1x128xf32>
    %c0_3 = arith.constant 0 : index
    %c0_4 = arith.constant 0 : index
    %c0_5 = arith.constant 0 : index
    %6 = vector.load %arg3[%c0_3, %c0_4, %c0_5] : memref<1x1x128xf32, #tpu.memory_space<vmem>>, vector<1x1x128xf32>
    %7 = vector.shape_cast %6 : vector<1x1x128xf32> to vector<1x128xf32>
    %8 = arith.mulf %5, %7 : vector<1x128xf32>
    %cst = arith.constant dense<0.000000e+00> : vector<1xf32>
    %9 = vector.multi_reduction <add>, %8, %cst [1] : vector<1x128xf32> to vector<1xf32>
    %10 = vector.shape_cast %9 : vector<1xf32> to vector<1x1xf32>
    %cst_6 = arith.constant 1.000000e-10 : f32
    %11 = vector.broadcast %cst_6 : f32 to vector<1x1xf32>
    %12 = arith.addf %10, %11 : vector<1x1xf32>
    %13 = tpu.reciprocal %12 {approx = true} : vector<1x1xf32> -> vector<1x1xf32>
    %14 = vector.broadcast %13 : vector<1x1xf32> to vector<1x128xf32>
    %15 = arith.mulf %8, %14 : vector<1x128xf32>
    %c0_7 = arith.constant 0 : index
    %c0_8 = arith.constant 0 : index
    %c0_9 = arith.constant 0 : index
    %16 = vector.load %arg6[%c0_7, %c0_8, %c0_9] : memref<1x1x128xf32, #tpu.memory_space<vmem>>, vector<1x1x128xf32>
    %17 = vector.shape_cast %16 : vector<1x1x128xf32> to vector<1x128xf32>
    %18 = vector.shape_cast %15 : vector<1x128xf32> to vector<1x1x128xf32>
    tpu.vector_store %arg6[%c0_7, %c0_8, %c0_9], %18 {strides = array<i32>} : memref<1x1x128xf32, #tpu.memory_space<vmem>>, vector<1x1x128xf32>,
    %c0_10 = arith.constant 0 : index
    %c0_11 = arith.constant 0 : index
    %c0_12 = arith.constant 0 : index
    %19 = vector.load %arg4[%c0_10, %c0_11, %c0_12] : memref<1x1x128xf32, #tpu.memory_space<vmem>>, vector<1x1x128xf32>
    %20 = vector.shape_cast %19 : vector<1x1x128xf32> to vector<1x128xf32>
    %21 = arith.addf %15, %20 : vector<1x128xf32>
    %c0_13 = arith.constant 0 : index
    %c0_14 = arith.constant 0 : index
    %c0_15 = arith.constant 0 : index
    %22 = vector.load %arg7[%c0_13, %c0_14, %c0_15] : memref<1x1x128xf32, #tpu.memory_space<vmem>>, vector<1x1x128xf32>
    %23 = vector.shape_cast %22 : vector<1x1x128xf32> to vector<1x128xf32>
    %24 = vector.shape_cast %21 : vector<1x128xf32> to vector<1x1x128xf32>
    tpu.vector_store %arg7[%c0_13, %c0_14, %c0_15], %24 {strides = array<i32>} : memref<1x1x128xf32, #tpu.memory_space<vmem>>, vector<1x1x128xf32>,
    %25 = arith.truncf %15 : vector<1x128xf32> to vector<1x128xbf16>
    %c0_16 = arith.constant 0 : index
    %c0_17 = arith.constant 0 : index
    %c0_18 = arith.constant 0 : index
    %26 = vector.load %arg5[%c0_16, %c0_17, %c0_18] : memref<1x32x128xbf16, #tpu.memory_space<vmem>>, vector<1x32x128xbf16>
    %27 = vector.shape_cast %26 : vector<1x32x128xbf16> to vector<32x128xbf16>
    %cst_19 = arith.constant dense<0.000000e+00> : vector<1x32xf32>
    %28 = tpu.matmul %25, %27, %cst_19 {dimension_numbers = #tpu.dot_dimension_numbers<[1], [1], [0], [0], [0, 0, 1, 0], [], []>} : vector<1x128xbf16>, vector<32x128xbf16>, vector<1x32xf32> -> vector<1x32xf32>
    %c0_20 = arith.constant 0 : index
    %c0_21 = arith.constant 0 : index
    %c0_22 = arith.constant 0 : index
    %29 = vector.load %arg8[%c0_20, %c0_21, %c0_22] : memref<1x1x32xf32, #tpu.memory_space<vmem>>, vector<1x1x32xf32>
    %30 = vector.shape_cast %29 : vector<1x1x32xf32> to vector<1x32xf32>
    %31 = vector.shape_cast %28 : vector<1x32xf32> to vector<1x1x32xf32>
    tpu.vector_store %arg8[%c0_20, %c0_21, %c0_22], %31 {strides = array<i32>} : memref<1x1x32xf32, #tpu.memory_space<vmem>>, vector<1x1x32xf32>,
    return
  }
  func.func @transform_0(%arg0: i32) -> i32 {
    %c0_i32 = arith.constant 0 : i32
    %c0_i32_0 = arith.constant 0 : i32
    return %c0_i32 : i32
  }
  func.func @transform_1(%arg0: i32) -> (i32, i32, i32) {
    %c0_i32 = arith.constant 0 : i32
    %c0_i32_0 = arith.constant 0 : i32
    %c0_i32_1 = arith.constant 0 : i32
    return %arg0, %c0_i32, %c0_i32_0 : i32, i32, i32
  }
  func.func @transform_2(%arg0: i32) -> (i32, i32, i32) {
    %c0_i32 = arith.constant 0 : i32
    %c0_i32_0 = arith.constant 0 : i32
    %c0_i32_1 = arith.constant 0 : i32
    return %arg0, %c0_i32, %c0_i32_0 : i32, i32, i32
  }
  func.func @transform_3(%arg0: i32) -> (i32, i32, i32) {
    %c0_i32 = arith.constant 0 : i32
    %c0_i32_0 = arith.constant 0 : i32
    %c0_i32_1 = arith.constant 0 : i32
    return %arg0, %c0_i32, %c0_i32_0 : i32, i32, i32
  }
  func.func @transform_4(%arg0: i32) -> (i32, i32, i32) {
    %c0_i32 = arith.constant 0 : i32
    %c0_i32_0 = arith.constant 0 : i32
    %c0_i32_1 = arith.constant 0 : i32
    return %arg0, %c0_i32, %c0_i32_0 : i32, i32, i32
  }
  func.func @transform_5(%arg0: i32) -> (i32, i32, i32) {
    %c0_i32 = arith.constant 0 : i32
    %c0_i32_0 = arith.constant 0 : i32
    %c0_i32_1 = arith.constant 0 : i32
    return %arg0, %c0_i32, %c0_i32_0 : i32, i32, i32
  }
  func.func @transform_6(%arg0: i32) -> (i32, i32, i32) {
    %c0_i32 = arith.constant 0 : i32
    %c0_i32_0 = arith.constant 0 : i32
    %c0_i32_1 = arith.constant 0 : i32
    return %arg0, %c0_i32, %c0_i32_0 : i32, i32, i32
  }
  func.func @transform_7(%arg0: i32) -> (i32, i32, i32) {
    %c0_i32 = arith.constant 0 : i32
    %c0_i32_0 = arith.constant 0 : i32
    %c0_i32_1 = arith.constant 0 : i32
    return %arg0, %c0_i32, %c0_i32_0 : i32, i32, i32
  }
}

module attributes {stable_mosaic.version = 11 : i64} {
  func.func @_energy_kernel(%arg0: i32, %arg1: memref<1x128x128xbf16, #tpu.memory_space<vmem>>, %arg2: memref<1x32x128xbf16, #tpu.memory_space<vmem>>, %arg3: memref<1x1x32xf32, #tpu.memory_space<vmem>>, %arg4: memref<32x32xf32, #tpu.memory_space<vmem>>, %arg5: memref<32x1xf32, #tpu.memory_space<vmem>>, %arg6: memref<32x128xbf16, #tpu.memory_space<vmem>>, %arg7: memref<32x1xf32, #tpu.memory_space<vmem>>, %arg8: memref<1xf32, #tpu.memory_space<smem>>, %arg9: memref<1x1x128xf32, #tpu.memory_space<vmem>>) attributes {dimension_semantics = [#tpu.dimension_semantics<parallel>], iteration_bounds = array<i64: 2>, scalar_prefetch = 0 : i64, scratch_operands = 0 : i64, tpu.core_type = #tpu.core_type<tc>, window_params = [{transform_indices = @transform_0, window_bounds = array<i64: 1, 128, 128>}, {transform_indices = @transform_1, window_bounds = array<i64: 1, 32, 128>}, {transform_indices = @transform_2, window_bounds = array<i64: 1, 1, 32>}, {pipeline_mode = #tpu.pipeline_mode<synchronous>, transform_indices = @transform_3, window_bounds = array<i64: 32, 32>}, {pipeline_mode = #tpu.pipeline_mode<synchronous>, transform_indices = @transform_4, window_bounds = array<i64: 32, 1>}, {pipeline_mode = #tpu.pipeline_mode<synchronous>, transform_indices = @transform_5, window_bounds = array<i64: 32, 128>}, {pipeline_mode = #tpu.pipeline_mode<synchronous>, transform_indices = @transform_6, window_bounds = array<i64: 32, 1>}, {transform_indices = @transform_7, window_bounds = array<i64: 1>}, {transform_indices = @transform_8, window_bounds = array<i64: 1, 1, 128>}]} {
    %c0 = arith.constant 0 : index
    %c0_0 = arith.constant 0 : index
    %0 = vector.load %arg4[%c0, %c0_0] : memref<32x32xf32, #tpu.memory_space<vmem>>, vector<32x32xf32>
    %c0_1 = arith.constant 0 : index
    %c0_2 = arith.constant 0 : index
    %c0_3 = arith.constant 0 : index
    %1 = vector.load %arg3[%c0_1, %c0_2, %c0_3] : memref<1x1x32xf32, #tpu.memory_space<vmem>>, vector<1x1x32xf32>
    %2 = vector.shape_cast %1 : vector<1x1x32xf32> to vector<1x32xf32>
    %3 = vector.broadcast %2 : vector<1x32xf32> to vector<32x32xf32>
    %4 = arith.mulf %0, %3 : vector<32x32xf32>
    %cst = arith.constant dense<0.000000e+00> : vector<32xf32>
    %5 = vector.multi_reduction <add>, %4, %cst [1] : vector<32x32xf32> to vector<32xf32>
    %6 = vector.shape_cast %5 : vector<32xf32> to vector<32x1xf32>
    %c0_4 = arith.constant 0 : index
    %c0_5 = arith.constant 0 : index
    %7 = vector.load %arg5[%c0_4, %c0_5] : memref<32x1xf32, #tpu.memory_space<vmem>>, vector<32x1xf32>
    %8 = arith.addf %6, %7 : vector<32x1xf32>
    %c0_6 = arith.constant 0 : index
    %c0_7 = arith.constant 0 : index
    %9 = vector.load %arg6[%c0_6, %c0_7] : memref<32x128xbf16, #tpu.memory_space<vmem>>, vector<32x128xbf16>
    %c0_8 = arith.constant 0 : index
    %c0_9 = arith.constant 0 : index
    %c0_10 = arith.constant 0 : index
    %10 = vector.load %arg1[%c0_8, %c0_9, %c0_10] : memref<1x128x128xbf16, #tpu.memory_space<vmem>>, vector<1x128x128xbf16>
    %11 = vector.shape_cast %10 : vector<1x128x128xbf16> to vector<128x128xbf16>
    %cst_11 = arith.constant dense<0.000000e+00> : vector<32x128xf32>
    %12 = tpu.matmul %9, %11, %cst_11 {dimension_numbers = #tpu.dot_dimension_numbers<[1], [0], [0], [1], [0, 0, 1, 1], [], []>} : vector<32x128xbf16>, vector<128x128xbf16>, vector<32x128xf32> -> vector<32x128xf32>
    %13 = vector.broadcast %8 : vector<32x1xf32> to vector<32x128xf32>
    %14 = arith.addf %13, %12 : vector<32x128xf32>
    %c0_12 = arith.constant 0 : index
    %c0_13 = arith.constant 0 : index
    %c0_14 = arith.constant 0 : index
    %15 = vector.load %arg2[%c0_12, %c0_13, %c0_14] : memref<1x32x128xbf16, #tpu.memory_space<vmem>>, vector<1x32x128xbf16>
    %16 = vector.shape_cast %15 : vector<1x32x128xbf16> to vector<32x128xbf16>
    %17 = arith.extf %16 : vector<32x128xbf16> to vector<32x128xf32>
    %18 = arith.addf %14, %17 : vector<32x128xf32>
    %19 = math.tanh %18 : vector<32x128xf32>
    %c0_15 = arith.constant 0 : index
    %c0_16 = arith.constant 0 : index
    %20 = vector.load %arg7[%c0_15, %c0_16] : memref<32x1xf32, #tpu.memory_space<vmem>>, vector<32x1xf32>
    %21 = vector.broadcast %20 : vector<32x1xf32> to vector<32x128xf32>
    %22 = arith.mulf %21, %19 : vector<32x128xf32>
    %cst_17 = arith.constant dense<0.000000e+00> : vector<128xf32>
    %23 = vector.multi_reduction <add>, %22, %cst_17 [0] : vector<32x128xf32> to vector<128xf32>
    %24 = vector.shape_cast %23 : vector<128xf32> to vector<1x128xf32>
    %c0_18 = arith.constant 0 : index
    %25 = memref.load %arg8[%c0_18] : memref<1xf32, #tpu.memory_space<smem>>
    %26 = vector.broadcast %25 : f32 to vector<1x128xf32>
    %27 = arith.addf %24, %26 : vector<1x128xf32>
    %c0_19 = arith.constant 0 : index
    %c0_20 = arith.constant 0 : index
    %c0_21 = arith.constant 0 : index
    %28 = vector.load %arg9[%c0_19, %c0_20, %c0_21] : memref<1x1x128xf32, #tpu.memory_space<vmem>>, vector<1x1x128xf32>
    %29 = vector.shape_cast %28 : vector<1x1x128xf32> to vector<1x128xf32>
    %30 = vector.shape_cast %27 : vector<1x128xf32> to vector<1x1x128xf32>
    tpu.vector_store %arg9[%c0_19, %c0_20, %c0_21], %30 {strides = array<i32>} : memref<1x1x128xf32, #tpu.memory_space<vmem>>, vector<1x1x128xf32>,
    return
  }
  func.func @transform_0(%arg0: i32) -> (i32, i32, i32) {
    %c0_i32 = arith.constant 0 : i32
    %c0_i32_0 = arith.constant 0 : i32
    %c0_i32_1 = arith.constant 0 : i32
    return %arg0, %c0_i32, %c0_i32_0 : i32, i32, i32
  }
  func.func @transform_1(%arg0: i32) -> (i32, i32, i32) {
    %c0_i32 = arith.constant 0 : i32
    %c0_i32_0 = arith.constant 0 : i32
    %c0_i32_1 = arith.constant 0 : i32
    return %arg0, %c0_i32, %c0_i32_0 : i32, i32, i32
  }
  func.func @transform_2(%arg0: i32) -> (i32, i32, i32) {
    %c0_i32 = arith.constant 0 : i32
    %c0_i32_0 = arith.constant 0 : i32
    %c0_i32_1 = arith.constant 0 : i32
    return %arg0, %c0_i32, %c0_i32_0 : i32, i32, i32
  }
  func.func @transform_3(%arg0: i32) -> (i32, i32) {
    %c0_i32 = arith.constant 0 : i32
    %c0_i32_0 = arith.constant 0 : i32
    %c0_i32_1 = arith.constant 0 : i32
    return %c0_i32, %c0_i32_0 : i32, i32
  }
  func.func @transform_4(%arg0: i32) -> (i32, i32) {
    %c0_i32 = arith.constant 0 : i32
    %c0_i32_0 = arith.constant 0 : i32
    %c0_i32_1 = arith.constant 0 : i32
    return %c0_i32, %c0_i32_0 : i32, i32
  }
  func.func @transform_5(%arg0: i32) -> (i32, i32) {
    %c0_i32 = arith.constant 0 : i32
    %c0_i32_0 = arith.constant 0 : i32
    %c0_i32_1 = arith.constant 0 : i32
    return %c0_i32, %c0_i32_0 : i32, i32
  }
  func.func @transform_6(%arg0: i32) -> (i32, i32) {
    %c0_i32 = arith.constant 0 : i32
    %c0_i32_0 = arith.constant 0 : i32
    %c0_i32_1 = arith.constant 0 : i32
    return %c0_i32, %c0_i32_0 : i32, i32
  }
  func.func @transform_7(%arg0: i32) -> i32 {
    %c0_i32 = arith.constant 0 : i32
    %c0_i32_0 = arith.constant 0 : i32
    return %c0_i32 : i32
  }
  func.func @transform_8(%arg0: i32) -> (i32, i32, i32) {
    %c0_i32 = arith.constant 0 : i32
    %c0_i32_0 = arith.constant 0 : i32
    %c0_i32_1 = arith.constant 0 : i32
    return %arg0, %c0_i32, %c0_i32_0 : i32, i32, i32
  }
}

</mosaic_0001>

<bundles_post_ra>
// kernel: attention_forward.3
= control target key start
LH: loop header
LB: loop body
LE: loop exit
PB: predicated region body
PF: predicated region fallthrough
CT: control target
= control target key end

     0   :  { %s863_s0 = inlined_call_operand.<no memory space> [shape: f32[1], index: 0, kind: input, shape index: {}]   ;;  %s864_s1 = inlined_call_operand.vmem [shape: f32[2,1,128], index: 1, kind: input, shape index: {}]   ;;  %s865_s2 = inlined_call_operand.vmem [shape: f32[2,1,128], index: 2, kind: input, shape index: {}]   ;;  %s866_s3 = inlined_call_operand.vmem [shape: f32[2,1,128], index: 3, kind: input, shape index: {}]   ;;  %s867_s4 = inlined_call_operand.vmem [shape: bf16[2,32,128], index: 4, kind: input, shape index: {}]   ;;  %s868_s5 = inlined_call_operand.vmem [shape: f32[2,1,128], index: 5, kind: output, shape index: {0}]   ;;  %s869_s6 = inlined_call_operand.vmem [shape: f32[2,1,128], index: 6, kind: output, shape index: {1}]   ;;  %s870_s7 = inlined_call_operand.hbm [shape: f32[2,1,32], index: 7, kind: output, shape index: {2}]  }
   0x1   :  { %13 = sst [smem:[#allocation2]] %s863_s0 }
   0x2   :  { %14 = vsyncpa [#allocation4], 0 }
   0x3   :  { %16 = vsyncpa [#allocation4 + $0x1], 0  ;;  %s740_s26 = smov 0   ;;  %s742_s27 = smov 0  }
   0x4   :  { %s744_s28 = smov 0   ;;  %s746_s29 = smov 0  }
   0x5 LB: > { %s761_s0 = sadd.s32 4294967295, %s692_s29   ;;  %s560_s30 = sadd.s32 4294967294, %s692_s29   ;;  %s692_s29 = sphi %s746_s29, %s876_s29   ;;  %s688_s28 = sphi %s744_s28, %s875_s28   ;;  %s684_s27 = sphi %s742_s27, %s874_s27   ;;  %s680_s26 = sphi %s740_s26, %s873_s26  }
   0x6   : > { %s765_s8 = sadd.s32 1, %s692_s29   ;;  %s206_s9 = sadd.s32 1, %s688_s28 }
   0x7   : > { %s203_s10 = ssub.s32 %s692_s29, %s765_s8  ;;  %p216_p0 = scmp.ne.s32.totalorder %s688_s28, %s684_s27 }
   0x8   : > { %p204_p1 = scmp.eq.s32.totalorder %s203_s10, 0  ;;  %p217_p2 = scmp.eq.s32.totalorder %s761_s0, 1 }
   0x9   : > { %p222_p3 = scmp.ne.s32.totalorder %s684_s27, %s680_s26  ;;  %p223_p4 = scmp.eq.s32.totalorder %s560_s30, 1 }
   0xa   : > { %s776_s11 = scalar_select %p204_p1, %s688_s28, %s206_s9  }
   0xb   : > { %p778_p5 = por %p217_p2, %p216_p0  ;;  %p782_p6 = por %p223_p4, %p222_p3 }
   0xc   : > { %p563_p7 = scmp.ge.s32.totalorder %s692_s29, 1  ;;  %p270_p8 = scmp.lt.s32.totalorder %s692_s29, 3 }
   0xe   : > { %p271_p9 = pnand %p563_p7, %p270_p8 }
   0xf   : > { %p316_p10 = scmp.lt.s32.totalorder (!%p271_p9), %s761_s0, 1  ;;  %s337_s14 = sld [smem:[#allocation2]] (!%p271_p9)  ;;  %vm345_vm0 = vcmask (!%p271_p9), 1040384   ;;  %v694_v9 = vmov (!%p271_p9), 0.0   ;;  %vm695_vm1 = vmmov (!%p271_p9), 0   ;;  %vm413_vm2 = vcmask (!%p271_p9), 253952  }
  0x10   : > { %274 = sbr.rel (%p271_p9) target bundleno = 431 (0x1af), region = 40  ;;  %575 = vmatprep.subr.bf16.mxu0 (!%p271_p9), %v694_v9  ;;  %579 = vmatprep.mubr.msk.bf16.mxu0 (!%p271_p9), %vm695_vm1, %v694_v9 }
  0x15   : > { %v339_v1 = vstv (!%p271_p9), %s337_s14 }
  0x17   : > { %s790_s15 = scalar_select %p316_p10, %s761_s0, 1 }
  0x19   : > { %s318_s18 = scalar_lea.vmem %s864_s1, %s790_s15  ;;  %s321_s21 = scalar_lea.vmem %s865_s2, %s790_s15 }
  0x1a   : > { %v338_v0 = vld [vmem:[%s318_s18] sm:$0x1]  ;;  %s571_s22 = sshll.u32 %s790_s15, 4  ;;  %s324_s10 = scalar_lea.vmem %s866_s3, %s790_s15 }
  0x1b   : > { %v340_v2 = vsub.f32 %v338_v0, %v339_v1  ;;  %v343_v4 = vld [vmem:[%s321_s21] sm:$0x1]  ;;  %s329_s25 = scalar_lea.vmem %s867_s4, %s571_s22  ;;  %s332_s17 = scalar_lea.vmem %s868_s5, %s790_s15 }
  0x1c   : > { %v624_v8 = vld [vmem:[%s329_s25] sm:$0xff]   ;;  %v625_v10 = vld [vmem:[%s329_s25 + $0x8] sm:$0xff]   ;;  %s335_s20 = scalar_lea.vmem %s869_s6, %s790_s15  ;;  %s314_s21 = sand.u32 1, %s684_s27  }
  0x1d   : > { %v341_v3 = vmul.f32 1.442695, %v340_v2  ;;  %576 = vmatpush3.bf16.xpose.msra.mxu0 %v624_v8  ;;  %v353_v14 = vld [vmem:[%s324_s10] sm:$0x1]  ;;  %s568_s22 = sshll.u32 %s761_s0, 4  ;;  %s315_s23 = scalar_lea.vmem [#allocation3], %s314_s21 }
  0x1e   : > { %577 = vmatprep.subr.bf16.mxu0 %v694_v9  ;;  %s440_s24 = sshll.u32 %s315_s23, 4  ;;  %s821_s9 = scalar_lea.hbm %s870_s7, %s568_s22  ;;  %s823_s24 = int_to_ptr.vmem [resolvable:$true] %s440_s24 }
  0x1f   : > { %626 = vpow2.f32 %v341_v3  ;;  %s422_s15 = scalar_lea.sflag [#allocation4], %s314_s21  ;;  %s630_s10 = scalar_lea.vmem %s823_s24, 16 }
  0x20   : > { %p631_p11 = scmp.ne.s32.totalorder %s823_s24, %s630_s10  ;;  %s696_s0 = smov [#allocation3]  }
  0x21   : > { %s634_s14 = sshll.u32 %s696_s0, 4  ;;  %s635_s14 = int_to_ptr.vmem [resolvable:$false] %s634_s14 }
  0x22   : > { %p632_p12 = pnand %p631_p11, %p778_p5  ;;  %s636_s16 = scalar_lea.vmem %s635_s14, 32 }
  0x23   : > { %p637_p0 = scmp.lt.s32.totalorder %s823_s24, %s635_s14  ;;  %p638_p1 = scmp.lt.s32.totalorder %s636_s16, %s630_s10 }
  0x24   : > { %p633_p13 = pneg %p632_p12 }
  0x25   : > { %578 = vmatpush3.bf16.xpose.msra.mxu0 %v625_v10  ;;  %p639_p2 = por %p638_p1, %p637_p0 }
  0x27   : > { %p640_p3 = pnand %p639_p2, %p633_p13 }
  0x29   : > { %v627_v5 = vpop.eup %626 }
  0x2a   : > { %v344_v6 = vmul.f32 %v627_v5, %v343_v4 }
  0x2c   : > { %v346_v7 = vsel %vm345_vm0, %v344_v6, 0.0 }
  0x2d   : > { %347 = vadd.xlane.f32.xlu0 %v346_v7 }
  0xba   : > { %v348_v11 = vpop.xlane.xlu0 %347 }
  0xbb   : > { %v349_v12 = vadd.f32 1e-10, %v348_v11 }
  0xbd   : > { %628 = vrcp.f32 %v349_v12 }
  0xc7   : > { %v629_v13 = vpop.eup %628 }
  0xc8   : > { %v351_v15 = vmul.f32 %v629_v13, %v344_v6 }
  0xca   : > { %352 = vst [vmem:[%s332_s17] sm:$0x1] %v351_v15  ;;  %v354_v16 = vadd.f32 %v353_v14, %v351_v15  ;;  %v356_v17 = vpack.c.bf16 %v351_v15, %v351_v15 }
  0xcc   : > { %355 = vst [vmem:[%s335_s20] sm:$0x1] %v354_v16  ;;  %580 = vmatmul.mubr.bf16.vlgmr.msra.gmra.mrb[0].mxu0 %v356_v17 }
 0x19f   : > { %v407_v18 = vpop.f32.mrb[0].mxu0 }
 0x1a0   : > { %414 = vst.msk [vmem:[%s315_s23] sm:$0x1] %vm413_vm2, %v407_v18  ;;  %v581_v19 = vpop.f32.mrb[1].mxu0 }
 0x1a1   : > { %v410_v20 = vpop.f32.mrb[2].mxu0 }
 0x1a2   : > { %643 = shalt.err (!%p640_p3)
}
 0x1a3   : > { %s644_s17 = scalar_lea.hbm %s821_s9, 16  ;;  %s648_s20 = scalar_lea.hbm %s870_s7, 32 }
 0x1a4   : > { %p645_p4 = scmp.ne.s32.totalorder %s821_s9, %s644_s17  ;;  %p649_p9 = scmp.lt.u32.totalorder %s821_s9, %s870_s7 }
 0x1a5   : > { %p650_p10 = scmp.lt.u32.totalorder %s648_s20, %s644_s17  ;;  %p652_p12 = scmp.lt.u32.totalorder %s644_s17, %s821_s9 }
 0x1a6   : > { %p646_p7 = pnand %p645_p4, %p778_p5 }
 0x1a7   : > { %p651_p11 = por %p650_p10, %p649_p9 }
 0x1a8   : > { %p647_p8 = pneg %p646_p7 }
 0x1a9   : > { %p653_p13 = por %p652_p12, %p651_p11 }
 0x1ab   : > { %p654_p0 = pnand %p653_p13, %p647_p8 }
 0x1ad   : > { %657 = shalt.err (!%p654_p0)
}
 0x1ae   : > { %583 = dma.vmem_to_hbm [thread:$0]  (%p778_p5), %s823_s24, 16, %s821_s9, %s422_s15   ;;  %v582_v21 = vpop.f32.mrb[3].mxu0 }
 0x1af PF: > { %p589_p1 = scmp.ge.s32.totalorder %s692_s29, 2  ;;  %s464_s23 = sand.u32 1, %s680_s26  }
 0x1b0   : > { %s465_s25 = scalar_lea.sflag [#allocation4], %s464_s23 }
 0x1b1   : > { %p586_p2 = pnand %p589_p1, %p782_p6 }
 0x1b3   : > { %675 = dma.done.wait (!%p586_p2), %s465_s25, 16  }
 0x1b4   : > { %677 = vsyncadd (!%p586_p2), %s465_s25, 4294967280  ;;  %p19_p3 = scmp.ge.s32.totalorder %s765_s8, 4   ;;  %s873_s26 = smov %s684_s27 }
 0x1b5   : > { %s874_s27 = smov %s688_s28  ;;  %s875_s28 = smov %s776_s11 }
 0x1b6   : > { %s876_s29 = smov %s765_s8  ;;  %21 = sbr.rel (!%p19_p3) target bundleno = 5 (0x5), region = 108 }
 0x1bd   :  { %469 = vsyncpa [#allocation4], 1 }
 0x1be   :  { %471 = vsyncpa [#allocation4 + $0x1], 1 }

// kernel: attention_forward.2
= control target key start
LH: loop header
LB: loop body
LE: loop exit
PB: predicated region body
PF: predicated region fallthrough
CT: control target
= control target key end

     0   :  { %s801_s29 = smov 0   ;;  %s882_s0 = inlined_call_operand.vmem [shape: bf16[2,128,128], index: 0, kind: input, shape index: {}]   ;;  %s883_s1 = inlined_call_operand.vmem [shape: bf16[2,32,128], index: 1, kind: input, shape index: {}]   ;;  %s884_s2 = inlined_call_operand.vmem [shape: f32[2,1,32], index: 2, kind: input, shape index: {}]   ;;  %s885_s3 = inlined_call_operand.vmem [shape: f32[32,32], index: 3, kind: input, shape index: {}]   ;;  %s886_s4 = inlined_call_operand.vmem [shape: f32[32,1], index: 4, kind: input, shape index: {}]   ;;  %s887_s5 = inlined_call_operand.vmem [shape: bf16[32,128], index: 5, kind: input, shape index: {}]   ;;  %s888_s6 = inlined_call_operand.vmem [shape: f32[32,1], index: 6, kind: input, shape index: {}]   ;;  %s889_s7 = inlined_call_operand.<no memory space> [shape: f32[1], index: 7, kind: input, shape index: {}]   ;;  %s890_s8 = inlined_call_operand.vmem [shape: f32[2,1,128], index: 8, kind: output, shape index: {}]  }
   0x1   :  { %13 = sst [smem:[#allocation2]] %s889_s7 }
   0x2 LB: > { %s652_s30 = sadd.s32 4294967295, %s750_s29   ;;  %p656_p0 = scmp.ge.s32.totalorder %s750_s29, 1  ;;  %s750_s29 = sphi %s801_s29, %s19_s29  }
   0x3   : > { %p281_p1 = scmp.lt.s32.totalorder %s750_s29, 3 }
   0x5   : > { %p282_p2 = pnand %p656_p0, %p281_p1 }
   0x6   : > { %p321_p3 = scmp.lt.s32.totalorder (!%p282_p2), %s652_s30, 1  ;;  %v338_v0 = vld [vmem:[%s885_s3] sm:$0xff] (!%p282_p2)  ;;  %v339_v2 = vld [vmem:[%s885_s3 + $0x8] sm:$0xff] (!%p282_p2)  ;;  %v340_v3 = vld [vmem:[%s885_s3 + $0x10] sm:$0xff] (!%p282_p2)  ;;  %vm353_vm0 = vcmask (!%p282_p2), 261120   ;;  %v752_v20 = vmov (!%p282_p2), 0  }
   0x7   : > { %285 = sbr.rel (%p282_p2) target bundleno = 339 (0x153), region = 52  ;;  %v734_v1 = vld [vmem:[%s887_s5] sm:$0xff] (!%p282_p2)   ;;  %v341_v4 = vld [vmem:[%s885_s3 + $0x18] sm:$0xff] (!%p282_p2)  ;;  %724 = vset.pattern.permute.xlu0 (!%p282_p2), %v752_v20  ;;  %725 = vset.pattern.permute.xlu1 (!%p282_p2), %v752_v20  ;;  %v735_v23 = vld [vmem:[%s887_s5 + $0x8] sm:$0xff] (!%p282_p2)   ;;  %s580_s26 = sld [smem:[#allocation2]] (!%p282_p2) }
   0x8   : > { %711 = vmatprep.mubr.bf16.mxu0 (!%p282_p2), %v734_v1  ;;  %v366_v24 = vld [vmem:[%s886_s4] sm:$0xff] (!%p282_p2)  ;;  %v367_v27 = vld [vmem:[%s886_s4 + $0x8] sm:$0xff] (!%p282_p2)  ;;  %v368_v30 = vld [vmem:[%s886_s4 + $0x10] sm:$0xff] (!%p282_p2) }
   0x9   : > { %v369_v33 = vld [vmem:[%s886_s4 + $0x18] sm:$0xff] (!%p282_p2)  ;;  %v543_v36 = vld [vmem:[%s888_s6] sm:$0xff] (!%p282_p2)  ;;  %v544_v37 = vld [vmem:[%s888_s6 + $0x8] sm:$0xff] (!%p282_p2) }
   0xa   : > { %v545_v38 = vld [vmem:[%s888_s6 + $0x10] sm:$0xff] (!%p282_p2)  ;;  %v546_v39 = vld [vmem:[%s888_s6 + $0x18] sm:$0xff] (!%p282_p2) }
   0xe   : > { %s892_s30 = smov (!%p321_p3, %s652_s30), 1 }
   0xf   : > { %s333_s20 = scalar_lea.vmem %s884_s2, %s892_s30  ;;  %s674_s21 = sshll.u32 %s892_s30, 6 }
  0x10   : > { %v661_v5 = vld [vmem:[%s333_s20] ss:$0 sm:$0xff]  ;;  %s834_s24 = scalar_lea.vmem %s882_s0, %s674_s21  ;;  %s675_s22 = sshll.u32 %s892_s30, 4 }
  0x11   : > { %v349_v6 = vmul.f32 %v661_v5, %v338_v0  ;;  %v350_v7 = vmul.f32 %v661_v5, %v339_v2  ;;  %v351_v8 = vmul.f32 %v661_v5, %v340_v3  ;;  %v352_v9 = vmul.f32 %v661_v5, %v341_v4  ;;  %v726_v10 = vld [vmem:[%s834_s24] sm:$0xff]   ;;  %v727_v11 = vld [vmem:[%s834_s24 + $0x8] sm:$0xff]   ;;  %v728_v16 = vld [vmem:[%s834_s24 + $0x10] sm:$0xff]   ;;  %s330_s25 = scalar_lea.vmem %s883_s1, %s675_s22  ;;  %s336_s9 = scalar_lea.vmem %s890_s8, %s892_s30 }
  0x12   : > { %695 = vmatprep.subr.bf16.mxu0 %v726_v10  ;;  %v729_v17 = vld [vmem:[%s834_s24 + $0x18] sm:$0xff]   ;;  %v730_v18 = vld [vmem:[%s834_s24 + $0x20] sm:$0xff]   ;;  %v731_v19 = vld [vmem:[%s834_s24 + $0x28] sm:$0xff]  }
  0x13   : > { %v354_v12 = vsel %vm353_vm0, %v349_v6, 0.0  ;;  %v360_v13 = vsel %vm353_vm0, %v351_v8, 0.0  ;;  %v357_v14 = vsel %vm353_vm0, %v350_v7, 0.0  ;;  %v363_v15 = vsel %vm353_vm0, %v352_v9, 0.0  ;;  %696 = vmatpush3.bf16.msra.mxu0 %v726_v10  ;;  %v732_v21 = vld [vmem:[%s834_s24 + $0x30] sm:$0xff]   ;;  %v733_v22 = vld [vmem:[%s834_s24 + $0x38] sm:$0xff]  }
  0x14   : > { %355 = vadd.xlane.f32.xlu0 %v354_v12  ;;  %361 = vadd.xlane.f32.xlu1 %v360_v13  ;;  %v677_v44 = vld [vmem:[%s330_s25] sm:$0xff]   ;;  %v684_v51 = vld [vmem:[%s330_s25 + $0x8] sm:$0xff]  }
  0x15   : > { %697 = vmatprep.subr.bf16.mxu0 %v727_v11  ;;  %v678_v46 = vunpack.c.l.bf16 %v677_v44  ;;  %v679_v48 = vunpack.c.h.bf16 %v677_v44  ;;  %v682_v54 = vunpack.c.l.bf16 %v684_v51  ;;  %v683_v58 = vunpack.c.h.bf16 %v684_v51 }
  0x17   : > { %698 = vmatpush3.bf16.msra.mxu0 %v727_v11 }
  0x18   : > { %358 = vadd.xlane.f32.xlu0 %v357_v14  ;;  %364 = vadd.xlane.f32.xlu1 %v363_v15 }
  0x19   : > { %699 = vmatprep.subr.bf16.mxu0 %v728_v16 }
  0x1b   : > { %700 = vmatpush3.bf16.msra.mxu0 %v728_v16 }
  0x1c   : > { %701 = vmatprep.subr.bf16.mxu0 %v729_v17 }
  0x1f   : > { %702 = vmatpush3.bf16.msra.mxu0 %v729_v17 }
  0x20   : > { %703 = vmatprep.subr.bf16.mxu0 %v730_v18 }
  0x23   : > { %704 = vmatpush3.bf16.msra.mxu0 %v730_v18  ;;  %v581_v18 = vstv %s580_s26 }
  0x24   : > { %705 = vmatprep.subr.bf16.mxu0 %v731_v19 }
  0x27   : > { %706 = vmatpush3.bf16.msra.mxu0 %v731_v19 }
  0x28   : > { %707 = vmatprep.subr.bf16.mxu0 %v732_v21 }
  0x2b   : > { %708 = vmatpush3.bf16.msra.mxu0 %v732_v21 }
  0x2c   : > { %709 = vmatprep.subr.bf16.mxu0 %v733_v22 }
  0x2f   : > { %710 = vmatpush3.bf16.msra.mxu0 %v733_v22 }
  0x32   : > { %712 = vmatmul.mubr.bf16.vlgmr.msra.gmra.mrb[0].mxu0 %v735_v23 }
  0xa1   : > { %v356_v25 = vpop.xlane.xlu0 %355  ;;  %v362_v28 = vpop.xlane.xlu1 %361 }
  0xa2   : > { %v370_v26 = vadd.f32 %v366_v24, %v356_v25  ;;  %v372_v32 = vadd.f32 %v368_v30, %v362_v28 }
  0xa4   : > { %505 = vperm.xlu0 %724, %v370_v26  }
  0xa5   : > { %v359_v29 = vpop.xlane.xlu0 %358  ;;  %v365_v34 = vpop.xlane.xlu1 %364 }
  0xa6   : > { %v371_v31 = vadd.f32 %v367_v27, %v359_v29  ;;  %v373_v35 = vadd.f32 %v369_v33, %v365_v34 }
  0xa8   : > { %510 = vperm.xlu1 %725, %v371_v31  }
  0xac   : > { %515 = vperm.xlu1 %725, %v372_v32  }
  0xb0   : > { %520 = vperm.xlu1 %725, %v373_v35  }
  0xb4   : > { %549 = vperm.xlu1 %725, %v543_v36  }
  0xb8   : > { %554 = vperm.xlu1 %725, %v544_v37  }
  0xbc   : > { %559 = vperm.xlu1 %725, %v545_v38  }
  0xc0   : > { %564 = vperm.xlu1 %725, %v546_v39  }
 0x105   : > { %v713_v40 = vpop.f32.mrb[0].mxu0 }
 0x106   : > { %v488_v41 = vpop.f32.mrb[1].mxu0 }
 0x107   : > { %v714_v42 = vpop.f32.mrb[2].mxu0 }
 0x108   : > { %v491_v43 = vpop.f32.mrb[3].mxu0 }
 0x123   : > { %v506_v45 = vpop.permute.xlu0 %505 }
 0x124   : > { %v523_v47 = vadd.f32 %v506_v45, %v488_v41 }
 0x126   : > { %v535_v49 = vadd.f32 %v678_v46, %v523_v47 }
 0x127   : > { %v511_v50 = vpop.permute.xlu1 %510 }
 0x128   : > { %v524_v52 = vadd.f32 %v511_v50, %v491_v43  ;;  %736 = vtanh.f32 %v535_v49 }
 0x12a   : > { %v536_v53 = vadd.f32 %v679_v48, %v524_v52 }
 0x12b   : > { %v516_v55 = vpop.permute.xlu1 %515 }
 0x12c   : > { %738 = vtanh.f32 %v536_v53  ;;  %v525_v56 = vadd.f32 %v713_v40, %v516_v55 }
 0x12e   : > { %v537_v57 = vadd.f32 %v682_v54, %v525_v56 }
 0x12f   : > { %v521_v59 = vpop.permute.xlu1 %520 }
 0x130   : > { %740 = vtanh.f32 %v537_v57  ;;  %v526_v60 = vadd.f32 %v714_v42, %v521_v59 }
 0x132   : > { %v538_v61 = vadd.f32 %v683_v58, %v526_v60  ;;  %v737_v63 = vpop.eup %736 }
 0x133   : > { %v550_v62 = vpop.permute.xlu1 %549 }
 0x134   : > { %742 = vtanh.f32 %v538_v61  ;;  %v567_v2 = vmul.f32 %v737_v63, %v550_v62 }
 0x136   : > { %v739_v0 = vpop.eup %738 }
 0x137   : > { %v555_v1 = vpop.permute.xlu1 %554 }
 0x138   : > { %v568_v3 = vmul.f32 %v739_v0, %v555_v1 }
 0x13a   : > { %v741_v4 = vpop.eup %740  ;;  %v571_v5 = vadd.f32 %v568_v3, %v567_v2 }
 0x13b   : > { %v560_v6 = vpop.permute.xlu1 %559 }
 0x13c   : > { %v569_v7 = vmul.f32 %v741_v4, %v560_v6 }
 0x13e   : > { %v743_v8 = vpop.eup %742  ;;  %v572_v9 = vadd.f32 %v571_v5, %v569_v7 }
 0x13f   : > { %v565_v10 = vpop.permute.xlu1 %564 }
 0x140   : > { %v570_v11 = vmul.f32 %v743_v8, %v565_v10 }
 0x142   : > { %v573_v12 = vadd.f32 %v572_v9, %v570_v11 }
 0x144   : > { %v574_v13 = vrot.slane %v573_v12, 4 }
 0x146   : > { %v575_v14 = vadd.f32 %v574_v13, %v573_v12 }
 0x148   : > { %v576_v15 = vrot.slane %v575_v14, 2 }
 0x14a   : > { %v577_v16 = vadd.f32 %v576_v15, %v575_v14 }
 0x14c   : > { %v578_v17 = vrot.slane %v577_v16, 1 }
 0x14e   : > { %v579_v19 = vadd.f32 %v578_v17, %v577_v16 }
 0x150   : > { %v582_v20 = vadd.f32 %v581_v18, %v579_v19 }
 0x152   : > { %583 = vst [vmem:[%s336_s9] sm:$0x1] %v582_v20 }
 0x153 PF: > { %s19_s29 = sadd.s32 1, %s750_s29  }
 0x154   : > { %p16_p4 = scmp.ge.s32.totalorder %s19_s29, 4  }
 0x156   :  { %18 = sbr.rel (!%p16_p4) target bundleno = 2 (0x2), region = 88 }

</bundles_post_ra>
